<compile_context>
chip_gen: v6e
topology: v6e:2x2x1
jax: 0.10.0
libtpu: 0.0.40
codegen_flags: <defaults>
</compile_context>

<pallas_src>
import math

import jax
import jax.numpy as jnp
from jax.experimental import pallas as pl
from jax.experimental.pallas import tpu as pltpu

# Loss weights from BungeeNeRFConfig defaults.
COLOR_LOSS_WEIGHT = 1.0
DEPTH_LOSS_WEIGHT = 0.1
PROGRESSIVE_LOSS_WEIGHT = 0.05

_LANES = 128
_SUBLANE = 8
_MAX_TILE_ROWS = 512                 # ~85% of HBM roofline on v6e, safe on v7x
_WEIGHT_TILE_BYTES = 2 * 1024 * 1024  # per-buffer budget for the weights tile


def _round_up(x: int, m: int) -> int:
    return ((x + m - 1) // m) * m


# --------------------------------------------------------------------------
# Kernels: tiled partial-sum reductions with SMEM accumulator.
# --------------------------------------------------------------------------
def _mse_sum_kernel(p_ref, t_ref, out_ref, acc_ref):
    @pl.when(pl.program_id(0) == 0)
    def _init():
        acc_ref[0] = jnp.float32(0.0)

    d = p_ref[...] - t_ref[...]
    acc_ref[0] += jnp.sum(d * d)

    @pl.when(pl.program_id(0) == pl.num_programs(0) - 1)
    def _fin():
        out_ref[0, 0] = acc_ref[0]


def _smooth_l1_sum_kernel(p_ref, t_ref, out_ref, acc_ref):
    @pl.when(pl.program_id(0) == 0)
    def _init():
        acc_ref[0] = jnp.float32(0.0)

    d = p_ref[...] - t_ref[...]
    a = jnp.abs(d)
    # F.smooth_l1_loss with beta = 1.0 (zero-padded lanes give d == 0 -> 0).
    sl1 = jnp.where(a < 1.0, 0.5 * d * d, a - 0.5)
    acc_ref[0] += jnp.sum(sl1)

    @pl.when(pl.program_id(0) == pl.num_programs(0) - 1)
    def _fin():
        out_ref[0, 0] = acc_ref[0]


def _var_sum_kernel(w_ref, out_ref, acc_ref):
    # One-pass unbiased variance per row: var = (sumsq - sum^2/S) / (S - 1).
    # Zero-padded rows give sum == sumsq == 0 -> var == 0 (safe, no mask).
    @pl.when(pl.program_id(0) == 0)
    def _init():
        acc_ref[0] = jnp.float32(0.0)

    w = w_ref[...]
    s = jnp.float32(w.shape[-1])
    row_sum = jnp.sum(w, axis=-1, keepdims=True)
    row_sumsq = jnp.sum(w * w, axis=-1, keepdims=True)
    var = (row_sumsq - (row_sum * row_sum) / s) / (s - 1.0)
    acc_ref[0] += jnp.sum(var)

    @pl.when(pl.program_id(0) == pl.num_programs(0) - 1)
    def _fin():
        out_ref[0, 0] = acc_ref[0]


# --------------------------------------------------------------------------
# Wrapper helpers.
# --------------------------------------------------------------------------
def _flat_slab(x):
    """Flatten, zero-pad and reshape to a lane-dense (rows, 128) f32 slab."""
    flat = jnp.ravel(x).astype(jnp.float32)
    n = flat.shape[0]
    rows = _round_up(max(1, -(-n // _LANES)), _SUBLANE)
    tile_rows = min(_MAX_TILE_ROWS, rows)          # both multiples of 8
    rows = _round_up(rows, tile_rows)
    flat = jnp.pad(flat, (0, rows * _LANES - n))
    return flat.reshape(rows, _LANES), tile_rows


def _scalar_out_spec():
    return pl.BlockSpec((1, 1), lambda i: (0, 0),
                        memory_space=pltpu.MemorySpace.SMEM)


def _pairwise_reduce_sum(kernel, pred, tgt):
    """Sum of an elementwise function of (pred - tgt) over all elements."""
    p, tile = _flat_slab(pred)
    t, _ = _flat_slab(tgt)
    grid = p.shape[0] // tile
    out = pl.pallas_call(
        kernel,
        out_shape=jax.ShapeDtypeStruct((1, 1), jnp.float32),
        grid=(grid,),
        in_specs=[pl.BlockSpec((tile, _LANES), lambda i: (i, 0)),
                  pl.BlockSpec((tile, _LANES), lambda i: (i, 0))],
        out_specs=_scalar_out_spec(),
        scratch_shapes=[pltpu.SMEM((1,), jnp.float32)],
        compiler_params=pltpu.CompilerParams(
            dimension_semantics=("arbitrary",)),
    )(p, t)
    return out[0, 0]


def _weight_var_sum(weights):
    """Sum over rows of unbiased per-row variance of `weights` (last dim)."""
    w = weights.astype(jnp.float32)
    w2 = w.reshape(-1, w.shape[-1])
    n_rows, s = w2.shape

    # Row-tile sized to a per-buffer VMEM budget; multiple of 8 sublanes.
    budget_rows = max(_SUBLANE,
                      ((_WEIGHT_TILE_BYTES // (4 * s)) // _SUBLANE) * _SUBLANE)
    tile = min(_MAX_TILE_ROWS, budget_rows)
    rows_needed = _round_up(n_rows, _SUBLANE)
    tile = min(tile, rows_needed)
    rows_padded = _round_up(n_rows, tile)
    w2 = jnp.pad(w2, ((0, rows_padded - n_rows), (0, 0)))
    grid = rows_padded // tile

    out = pl.pallas_call(
        _var_sum_kernel,
        out_shape=jax.ShapeDtypeStruct((1, 1), jnp.float32),
        grid=(grid,),
        in_specs=[pl.BlockSpec((tile, s), lambda i: (i, 0))],
        out_specs=_scalar_out_spec(),
        scratch_shapes=[pltpu.SMEM((1,), jnp.float32)],
        compiler_params=pltpu.CompilerParams(
            dimension_semantics=("arbitrary",)),
    )(w2)
    return out[0, 0], n_rows


# --------------------------------------------------------------------------
# Public API: JAX/Pallas equivalent of BungeeNeRFLoss.forward.
# --------------------------------------------------------------------------
def bungee_nerf_loss(outputs, targets, stage: int = 0,
                     color_loss_weight: float = COLOR_LOSS_WEIGHT,
                     depth_loss_weight: float = DEPTH_LOSS_WEIGHT,
                     progressive_loss_weight: float = PROGRESSIVE_LOSS_WEIGHT):
    # --- color_loss: F.mse_loss(rgb_pred, rgb_gt), mean reduction ---
    rgb_p, rgb_t = outputs['rgb'], targets['rgb']
    n_rgb = math.prod(rgb_p.shape)
    color_loss = (_pairwise_reduce_sum(_mse_sum_kernel, rgb_p, rgb_t)
                  / jnp.float32(n_rgb))

    # --- depth_loss: F.smooth_l1_loss(depth_pred, depth_gt), beta=1.0 ---
    if ('depth' in outputs) and ('depth' in targets):
        d_p, d_t = outputs['depth'], targets['depth']
        n_d = math.prod(d_p.shape)
        depth_loss = (_pairwise_reduce_sum(_smooth_l1_sum_kernel, d_p, d_t)
                      / jnp.float32(n_d))
    else:
        depth_loss = jnp.float32(0.0)

    # --- progressive_loss: torch.var(weights, dim=-1).mean() (unbiased) ---
    if stage > 0 and ('weights' in outputs):
        # TODO(synk): matches torch.var ddof=1 -> NaN when the sample dim is 1.
        var_sum, n_rows = _weight_var_sum(outputs['weights'])
        progressive_loss = var_sum / jnp.float32(n_rows)
    else:
        progressive_loss = jnp.float32(0.0)

    total_loss = (color_loss_weight * color_loss
                  + depth_loss_weight * depth_loss
                  + progressive_loss_weight * progressive_loss)

    return {
        'color_loss': color_loss,
        'depth_loss': depth_loss,
        'progressive_loss': progressive_loss,
        'total_loss': total_loss,
    }


if __name__ == "__main__":
    key = jax.random.PRNGKey(0)
    k1, k2, k3, k4, k5 = jax.random.split(key, 5)
    n_rays, n_samples = 8, 64

    outputs = {
        'rgb': jax.random.uniform(k1, (n_rays, 3), jnp.float32),
        'depth': jax.random.uniform(k2, (n_rays,), jnp.float32) * 5.0,
        'weights': jax.nn.softmax(jax.random.normal(k3, (n_rays, n_samples)),
                                  axis=-1),
    }
    targets = {
        'rgb': jax.random.uniform(k4, (n_rays, 3), jnp.float32),
        'depth': jax.random.uniform(k5, (n_rays,), jnp.float32) * 5.0,
    }

    losses = bungee_nerf_loss(outputs, targets, stage=1)
    losses = jax.block_until_ready(losses)

    # Pure-JAX reference (same semantics as the PyTorch module).
    ref_color = jnp.mean((outputs['rgb'] - targets['rgb']) ** 2)
    d = outputs['depth'] - targets['depth']
    ref_depth = jnp.mean(jnp.where(jnp.abs(d) < 1.0,
                                   0.5 * d * d, jnp.abs(d) - 0.5))
    ref_prog = jnp.mean(jnp.var(outputs['weights'], axis=-1, ddof=1))
    ref_total = (COLOR_LOSS_WEIGHT * ref_color
                 + DEPTH_LOSS_WEIGHT * ref_depth
                 + PROGRESSIVE_LOSS_WEIGHT * ref_prog)

    assert jnp.allclose(losses['color_loss'], ref_color, atol=1e-5)
    assert jnp.allclose(losses['depth_loss'], ref_depth, atol=1e-5)
    assert jnp.allclose(losses['progressive_loss'], ref_prog, atol=1e-5)
    assert jnp.allclose(losses['total_loss'], ref_total, atol=1e-5)

    # Also exercise the statically-specialized paths (no depth, stage 0).
    losses_nd = jax.block_until_ready(
        bungee_nerf_loss({'rgb': outputs['rgb']}, {'rgb': targets['rgb']},
                         stage=0))
    assert jnp.allclose(losses_nd['depth_loss'], 0.0)
    assert jnp.allclose(losses_nd['progressive_loss'], 0.0)
    assert jnp.allclose(losses_nd['total_loss'],
                        COLOR_LOSS_WEIGHT * ref_color, atol=1e-5)

    print("KERNEL_OK")
</pallas_src>

<mosaic_0001>
module attributes {stable_mosaic.version = 11 : i64} {
  func.func @_mse_sum_kernel(%arg0: i32, %arg1: memref<8x128xf32, #tpu.memory_space<vmem>>, %arg2: memref<8x128xf32, #tpu.memory_space<vmem>>, %arg3: memref<1x1xf32, #tpu.memory_space<smem>>, %arg4: memref<1xf32, #tpu.memory_space<smem>>) attributes {dimension_semantics = [#tpu.dimension_semantics<arbitrary>], iteration_bounds = array<i64: 1>, scalar_prefetch = 0 : i64, scratch_operands = 1 : i64, tpu.core_type = #tpu.core_type<tc>, window_params = [{transform_indices = @transform_0, window_bounds = array<i64: 8, 128>}, {transform_indices = @transform_1, window_bounds = array<i64: 8, 128>}, {transform_indices = @transform_2, window_bounds = array<i64: 1, 1>}]} {
    %c0_i32 = arith.constant 0 : i32
    %0 = arith.cmpi eq, %arg0, %c0_i32 : i32
    %1 = arith.extui %0 : i1 to i32
    %c0_i32_0 = arith.constant 0 : i32
    %2 = arith.cmpi ne, %1, %c0_i32_0 : i32
    scf.if %2 {
      %cst_8 = arith.constant 0.000000e+00 : f32
      %c0_9 = arith.constant 0 : index
      %17 = memref.load %arg4[%c0_9] : memref<1xf32, #tpu.memory_space<smem>>
      memref.store %cst_8, %arg4[%c0_9] : memref<1xf32, #tpu.memory_space<smem>>
    } else {
    }
    %c0 = arith.constant 0 : index
    %c0_1 = arith.constant 0 : index
    %3 = vector.load %arg1[%c0, %c0_1] : memref<8x128xf32, #tpu.memory_space<vmem>>, vector<8x128xf32>
    %c0_2 = arith.constant 0 : index
    %c0_3 = arith.constant 0 : index
    %4 = vector.load %arg2[%c0_2, %c0_3] : memref<8x128xf32, #tpu.memory_space<vmem>>, vector<8x128xf32>
    %5 = arith.subf %3, %4 : vector<8x128xf32>
    %c0_4 = arith.constant 0 : index
    %6 = memref.load %arg4[%c0_4] : memref<1xf32, #tpu.memory_space<smem>>
    %7 = arith.mulf %5, %5 : vector<8x128xf32>
    %8 = vector.shape_cast %7 : vector<8x128xf32> to vector<1x8x128xf32>
    %cst = arith.constant dense<0.000000e+00> : vector<1xf32>
    %9 = vector.multi_reduction <add>, %8, %cst [1, 2] : vector<1x8x128xf32> to vector<1xf32>
    %10 = vector.shape_cast %9 : vector<1xf32> to vector<1x1x1xf32>
    %11 = vector.extract %10[0, 0, 0] : f32 from vector<1x1x1xf32>
    %12 = arith.addf %6, %11 : f32
    %c0_5 = arith.constant 0 : index
    %13 = memref.load %arg4[%c0_5] : memref<1xf32, #tpu.memory_space<smem>>
    memref.store %12, %arg4[%c0_5] : memref<1xf32, #tpu.memory_space<smem>>
    %c0_i32_6 = arith.constant 0 : i32
    %14 = arith.cmpi eq, %arg0, %c0_i32_6 : i32
    %15 = arith.extui %14 : i1 to i32
    %c0_i32_7 = arith.constant 0 : i32
    %16 = arith.cmpi ne, %15, %c0_i32_7 : i32
    scf.if %16 {
      %c0_8 = arith.constant 0 : index
      %17 = memref.load %arg4[%c0_8] : memref<1xf32, #tpu.memory_space<smem>>
      %c0_9 = arith.constant 0 : index
      %c0_10 = arith.constant 0 : index
      %18 = memref.load %arg3[%c0_9, %c0_10] : memref<1x1xf32, #tpu.memory_space<smem>>
      memref.store %17, %arg3[%c0_9, %c0_10] : memref<1x1xf32, #tpu.memory_space<smem>>
    } else {
    }
    return
  }
  func.func @transform_0(%arg0: i32) -> (i32, i32) {
    %c0_i32 = arith.constant 0 : i32
    %c0_i32_0 = arith.constant 0 : i32
    return %arg0, %c0_i32 : i32, i32
  }
  func.func @transform_1(%arg0: i32) -> (i32, i32) {
    %c0_i32 = arith.constant 0 : i32
    %c0_i32_0 = arith.constant 0 : i32
    return %arg0, %c0_i32 : i32, i32
  }
  func.func @transform_2(%arg0: i32) -> (i32, i32) {
    %c0_i32 = arith.constant 0 : i32
    %c0_i32_0 = arith.constant 0 : i32
    %c0_i32_1 = arith.constant 0 : i32
    return %c0_i32, %c0_i32_0 : i32, i32
  }
}

</mosaic_0001>

<bundles_post_ra>
// kernel: tpu_custom_call.1
= control target key start
LH: loop header
LB: loop body
LE: loop exit
PB: predicated region body
PF: predicated region fallthrough
CT: control target
= control target key end

     0   :  { %7 = vsyncpa [#allocation4], 0  ;;  %s166_s0 = inlined_call_operand.hbm [shape: f32[8,128], index: 0, kind: input, shape index: {}]   ;;  %s167_s1 = inlined_call_operand.hbm [shape: f32[8,128], index: 1, kind: input, shape index: {}]   ;;  %s168_s2 = inlined_call_operand.hbm [shape: f32[1,1], index: 2, kind: output, shape index: {}]  }
   0x1   :  { %8 = vsyncpa [#allocation7], 0 }
   0x2   :  { %9 = vsyncpa [#allocation5], 0  ;;  %s139_s9 = smov [#allocation3]   ;;  %s140_s11 = smov [#allocation6]  }
   0x3   :  { %s16_s10 = sshll.u32 %s139_s9, 4  ;;  %s26_s12 = sshll.u32 %s140_s11, 4  ;;  %s17_s10 = int_to_ptr.vmem [resolvable:$true] %s16_s10  ;;  %s27_s12 = int_to_ptr.vmem [resolvable:$true] %s26_s12 }
   0x4   :  { %s93_s13 = scalar_lea.vmem %s17_s10, 128  ;;  %p98_p1 = scmp.lt.s32.totalorder %s17_s10, %s17_s10 }
   0x5   :  { %p94_p0 = scmp.ne.s32.totalorder %s17_s10, %s93_s13  ;;  %p99_p2 = scmp.lt.s32.totalorder %s93_s13, %s93_s13 }
   0x7   :  { %p100_p3 = por %p99_p2, %p98_p1 }
   0x9   :  { %p101_p4 = pnand %p100_p3, %p94_p0 }
   0xb   :  { %104 = shalt.err (!%p101_p4)
}
   0xc   :  { %19 = dma.hbm_to_vmem [thread:$0]  %s166_s0, 128, %s17_s10, [#allocation4]  }
   0xd   :  { %s113_s16 = scalar_lea.vmem %s27_s12, 128  ;;  %p118_p6 = scmp.lt.s32.totalorder %s27_s12, %s27_s12 }
   0xe   :  { %p114_p5 = scmp.ne.s32.totalorder %s27_s12, %s113_s16  ;;  %p119_p7 = scmp.lt.s32.totalorder %s113_s16, %s113_s16 }
  0x10   :  { %p120_p8 = por %p119_p7, %p118_p6 }
  0x12   :  { %p121_p9 = pnand %p120_p8, %p114_p5 }
  0x14   :  { %124 = shalt.err (!%p121_p9)
}
  0x15   :  { %29 = dma.hbm_to_vmem [thread:$0]  %s167_s1, 128, %s27_s12, [#allocation7]  }
  0x16   :  { %133 = dma.done.wait [#allocation4], 128  }
  0x17   :  { %134 = vsyncadd [#allocation4], 4294967168 }
  0x18   :  { %135 = dma.done.wait [#allocation7], 128  }
  0x19   :  { %136 = vsyncadd [#allocation7], 4294967168  ;;  %v42_v0 = vld [vmem:[#allocation3] sm:$0xff]  ;;  %v43_v1 = vld [vmem:[#allocation6] sm:$0xff]  ;;  %s141_s1 = smov [#allocation8]  }
  0x1a   :  { %v44_v2 = vsub.f32 %v42_v0, %v43_v1 }
  0x1c   :  { %v46_v3 = vmul.f32 %v44_v2, %v44_v2 }
  0x1e   :  { %47 = vadd.xlane.f32.xlu0 %v46_v3 }
  0xa7   :  { %v48_v4 = vpop.xlane.xlu0 %47 }
  0xa8   :  { %v49_v5 = vrot.slane %v48_v4, 4 }
  0xaa   :  { %v50_v6 = vadd.f32 %v49_v5, %v48_v4 }
  0xac   :  { %v51_v7 = vrot.slane %v50_v6, 2 }
  0xae   :  { %v52_v8 = vadd.f32 %v51_v7, %v50_v6 }
  0xb0   :  { %v53_v9 = vrot.slane %v52_v8, 1 }
  0xb2   :  { %v54_v10 = vadd.f32 %v53_v9, %v52_v8 }
  0xb4   :  { %80 = vpush %v54_v10 }
  0xe5   :  { %s81_s0 = spop %80 }
  0xe6   :  { %64 = sst [smem:[#allocation8]] %s81_s0 }
  0xe7   :  { %72 = dma.smem_to_hbm %s141_s1, 16, %s168_s2, [#allocation5]  }
  0xe8   :  { %137 = dma.done.wait [#allocation5], 16  }
  0xe9   :  { %138 = vsyncadd [#allocation5], 4294967280 }
  0xea   :  { %76 = sfence }
  0xeb   :  { %77 = vsyncpa [#allocation4], 1 }
  0xec   :  { %78 = vsyncpa [#allocation7], 1 }
  0xed   :  { %79 = vsyncpa [#allocation5], 1 }

</bundles_post_ra>
